<compile_context>
chip_gen: v6e
topology: v6e:2x2x1
jax: 0.10.0
libtpu: 0.0.40
codegen_flags: <defaults>
</compile_context>

<pallas_src>
import jax
import jax.numpy as jnp
from jax import lax
from jax.experimental import pallas as pl
from jax.experimental.pallas import tpu as pltpu

EPS = 1e-5  # nn.BatchNorm2d default eps


def bn_kernel(x_ref, gamma_ref, beta_ref, o_ref):
    # x_ref / o_ref : (N, 1, Ct, HW)  one group's channel tile, native layout
    # gamma_ref     : (1, 1, Ct, 1)   affine scale (shared across groups)
    # beta_ref      : (1, 1, Ct, 1)   affine shift (shared across groups)
    x = x_ref[...]
    n_count = x.shape[0] * x.shape[3]          # N * H * W (static)
    inv_n = jnp.float32(1.0 / n_count)

    # Two-pass per-channel stats over (N, H*W): numerically safe (no E[x^2]
    # - E[x]^2 cancellation), data is VMEM-resident so the second pass is
    # pure VPU work.
    row_sum = jnp.sum(x, axis=3, keepdims=True)              # (N, 1, Ct, 1)
    mean = jnp.sum(row_sum, axis=0, keepdims=True) * inv_n   # (1, 1, Ct, 1)
    centered = x - mean
    row_sq = jnp.sum(centered * centered, axis=3, keepdims=True)
    var = jnp.sum(row_sq, axis=0, keepdims=True) * inv_n     # biased variance
    inv_std = lax.rsqrt(var + EPS)

    # Fold affine into per-channel scalars: out = a*x + b (2 VALU ops/elem).
    a = gamma_ref[...] * inv_std                              # (1, 1, Ct, 1)
    b = beta_ref[...] - mean * a
    o_ref[...] = x * a + b


def _choose_channel_tile(C, bytes_per_channel, budget_bytes):
    """Largest legal channel tile (multiple of 8 or full C) under the budget."""
    max_ct = max(1, budget_bytes // max(1, bytes_per_channel))
    if C <= max_ct:
        return C  # whole channel axis fits; full-dim block is always layout-legal
    best = 0
    for ct in range(8, C, 8):
        if C % ct == 0 and ct <= max_ct and ct > best:
            best = ct
    if best:
        return best
    # Nothing fit cleanly; prefer the smallest legal tile.
    return 8 if C % 8 == 0 else C


def grouped_batchnorm(x, gamma, beta, *, block_budget_bytes=4 << 20):
    """x: [N, G, C, H, W]; gamma, beta: [C]. Returns [N, G, C, H, W] float32."""
    N, G, C, H, W = x.shape
    hw = H * W

    # Free, contiguous reshape (no HBM transpose): [N, G, C, H, W] -> [N, G, C, HW]
    xr = x.reshape(N, G, C, hw).astype(jnp.float32)
    g = gamma.reshape(1, 1, C, 1).astype(jnp.float32)
    b = beta.reshape(1, 1, C, 1).astype(jnp.float32)

    bytes_per_channel = N * hw * 4  # one channel row across the whole batch, f32
    ct = _choose_channel_tile(C, bytes_per_channel, block_budget_bytes)
    grid = (G, C // ct)

    out = pl.pallas_call(
        bn_kernel,
        out_shape=jax.ShapeDtypeStruct((N, G, C, hw), jnp.float32),
        grid_spec=pltpu.PrefetchScalarGridSpec(
            num_scalar_prefetch=0,
            grid=grid,
            in_specs=[
                pl.BlockSpec((N, 1, ct, hw), lambda gi, ci: (0, gi, ci, 0)),
                pl.BlockSpec((1, 1, ct, 1), lambda gi, ci: (0, 0, ci, 0)),
                pl.BlockSpec((1, 1, ct, 1), lambda gi, ci: (0, 0, ci, 0)),
            ],
            out_specs=pl.BlockSpec((N, 1, ct, hw), lambda gi, ci: (0, gi, ci, 0)),
        ),
        compiler_params=pltpu.CompilerParams(
            # Every (group, channel-tile) block is independent -> both axes
            # parallel for megacore sharding; no accumulator needed.
            dimension_semantics=("parallel", "parallel"),
            # Safe on all generations (v5e default is only 16 MiB; v7x has
            # 64 MiB physical). Per-step footprint is kept well under this
            # by the block-budget choice above.
            vmem_limit_bytes=32 * 1024 * 1024,
        ),
        cost_estimate=pl.CostEstimate(
            flops=6 * N * G * C * hw,
            transcendentals=G * C,
            bytes_accessed=2 * N * G * C * hw * 4,
        ),
    )(xr, g, b)

    # Free contiguous reshape back to [N, G, C, H, W].
    return out.reshape(N, G, C, H, W)


def reference(x, gamma, beta):
    # Pure-JAX reference of the same semantics (per-group batch stats).
    xf = x.astype(jnp.float32)
    mean = jnp.mean(xf, axis=(0, 3, 4), keepdims=True)
    var = jnp.mean((xf - mean) ** 2, axis=(0, 3, 4), keepdims=True)
    g = gamma.reshape(1, 1, -1, 1, 1).astype(jnp.float32)
    b = beta.reshape(1, 1, -1, 1, 1).astype(jnp.float32)
    return (xf - mean) * lax.rsqrt(var + EPS) * g + b


if __name__ == "__main__":
    key = jax.random.PRNGKey(0)
    kx, kg, kb = jax.random.split(key, 3)

    N, G, C, H, W = 2, 3, 4, 8, 8  # in_channels = C = 4
    x = jax.random.normal(kx, (N, G, C, H, W), dtype=jnp.float32)
    # Non-trivial affine parameters (BatchNorm2d default is gamma=1, beta=0;
    # perturb to exercise the affine path).
    gamma = 1.0 + 0.1 * jax.random.normal(kg, (C,), dtype=jnp.float32)
    beta = 0.1 * jax.random.normal(kb, (C,), dtype=jnp.float32)

    out = grouped_batchnorm(x, gamma, beta)
    out = jax.block_until_ready(out)

    ref = reference(x, gamma, beta)
    assert out.shape == (N, G, C, H, W)
    assert jnp.allclose(out, ref, atol=1e-5, rtol=1e-5)

    print("KERNEL_OK")
</pallas_src>

<mosaic_0001>
module attributes {stable_mosaic.version = 11 : i64} {
  func.func @bn_kernel(%arg0: i32, %arg1: i32, %arg2: memref<2x1x4x64xf32, #tpu.memory_space<vmem>>, %arg3: memref<1x1x4x1xf32, #tpu.memory_space<vmem>>, %arg4: memref<1x1x4x1xf32, #tpu.memory_space<vmem>>, %arg5: memref<2x1x4x64xf32, #tpu.memory_space<vmem>>) attributes {dimension_semantics = [#tpu.dimension_semantics<parallel>, #tpu.dimension_semantics<parallel>], iteration_bounds = array<i64: 3, 1>, scalar_prefetch = 0 : i64, scratch_operands = 0 : i64, tpu.core_type = #tpu.core_type<tc>, window_params = [{transform_indices = @transform_0, window_bounds = array<i64: 2, 1, 4, 64>}, {transform_indices = @transform_1, window_bounds = array<i64: 1, 1, 4, 1>}, {transform_indices = @transform_2, window_bounds = array<i64: 1, 1, 4, 1>}, {transform_indices = @transform_3, window_bounds = array<i64: 2, 1, 4, 64>}]} {
    %c0 = arith.constant 0 : index
    %c0_0 = arith.constant 0 : index
    %c0_1 = arith.constant 0 : index
    %c0_2 = arith.constant 0 : index
    %0 = vector.load %arg2[%c0, %c0_0, %c0_1, %c0_2] : memref<2x1x4x64xf32, #tpu.memory_space<vmem>>, vector<2x1x4x64xf32>
    %cst = arith.constant dense<0.000000e+00> : vector<2x1x4xf32>
    %1 = vector.multi_reduction <add>, %0, %cst [3] : vector<2x1x4x64xf32> to vector<2x1x4xf32>
    %2 = vector.shape_cast %1 : vector<2x1x4xf32> to vector<2x1x4x1xf32>
    %cst_3 = arith.constant dense<0.000000e+00> : vector<1x4x1xf32>
    %3 = vector.multi_reduction <add>, %2, %cst_3 [0] : vector<2x1x4x1xf32> to vector<1x4x1xf32>
    %4 = vector.shape_cast %3 : vector<1x4x1xf32> to vector<1x1x4x1xf32>
    %cst_4 = arith.constant 7.812500e-03 : f32
    %5 = vector.broadcast %cst_4 : f32 to vector<1x1x4x1xf32>
    %6 = arith.mulf %4, %5 : vector<1x1x4x1xf32>
    %7 = vector.broadcast %6 : vector<1x1x4x1xf32> to vector<2x1x4x64xf32>
    %8 = arith.subf %0, %7 : vector<2x1x4x64xf32>
    %9 = arith.mulf %8, %8 : vector<2x1x4x64xf32>
    %cst_5 = arith.constant dense<0.000000e+00> : vector<2x1x4xf32>
    %10 = vector.multi_reduction <add>, %9, %cst_5 [3] : vector<2x1x4x64xf32> to vector<2x1x4xf32>
    %11 = vector.shape_cast %10 : vector<2x1x4xf32> to vector<2x1x4x1xf32>
    %cst_6 = arith.constant dense<0.000000e+00> : vector<1x4x1xf32>
    %12 = vector.multi_reduction <add>, %11, %cst_6 [0] : vector<2x1x4x1xf32> to vector<1x4x1xf32>
    %13 = vector.shape_cast %12 : vector<1x4x1xf32> to vector<1x1x4x1xf32>
    %cst_7 = arith.constant 7.812500e-03 : f32
    %14 = vector.broadcast %cst_7 : f32 to vector<1x1x4x1xf32>
    %15 = arith.mulf %13, %14 : vector<1x1x4x1xf32>
    %cst_8 = arith.constant 9.99999974E-6 : f32
    %16 = vector.broadcast %cst_8 : f32 to vector<1x1x4x1xf32>
    %17 = arith.addf %15, %16 : vector<1x1x4x1xf32>
    %18 = math.rsqrt %17 : vector<1x1x4x1xf32>
    %c0_9 = arith.constant 0 : index
    %c0_10 = arith.constant 0 : index
    %c0_11 = arith.constant 0 : index
    %c0_12 = arith.constant 0 : index
    %19 = vector.load %arg3[%c0_9, %c0_10, %c0_11, %c0_12] : memref<1x1x4x1xf32, #tpu.memory_space<vmem>>, vector<1x1x4x1xf32>
    %20 = arith.mulf %19, %18 : vector<1x1x4x1xf32>
    %c0_13 = arith.constant 0 : index
    %c0_14 = arith.constant 0 : index
    %c0_15 = arith.constant 0 : index
    %c0_16 = arith.constant 0 : index
    %21 = vector.load %arg4[%c0_13, %c0_14, %c0_15, %c0_16] : memref<1x1x4x1xf32, #tpu.memory_space<vmem>>, vector<1x1x4x1xf32>
    %22 = arith.mulf %6, %20 : vector<1x1x4x1xf32>
    %23 = arith.subf %21, %22 : vector<1x1x4x1xf32>
    %24 = vector.broadcast %20 : vector<1x1x4x1xf32> to vector<2x1x4x64xf32>
    %25 = arith.mulf %0, %24 : vector<2x1x4x64xf32>
    %26 = vector.broadcast %23 : vector<1x1x4x1xf32> to vector<2x1x4x64xf32>
    %27 = arith.addf %25, %26 : vector<2x1x4x64xf32>
    %c0_17 = arith.constant 0 : index
    %c0_18 = arith.constant 0 : index
    %c0_19 = arith.constant 0 : index
    %c0_20 = arith.constant 0 : index
    %28 = vector.load %arg5[%c0_17, %c0_18, %c0_19, %c0_20] : memref<2x1x4x64xf32, #tpu.memory_space<vmem>>, vector<2x1x4x64xf32>
    tpu.vector_store %arg5[%c0_17, %c0_18, %c0_19, %c0_20], %27 {strides = array<i32>} : memref<2x1x4x64xf32, #tpu.memory_space<vmem>>, vector<2x1x4x64xf32>,
    return
  }
  func.func @transform_0(%arg0: i32, %arg1: i32) -> (i32, i32, i32, i32) {
    %c0_i32 = arith.constant 0 : i32
    %c0_i32_0 = arith.constant 0 : i32
    %c0_i32_1 = arith.constant 0 : i32
    return %c0_i32, %arg0, %arg1, %c0_i32_0 : i32, i32, i32, i32
  }
  func.func @transform_1(%arg0: i32, %arg1: i32) -> (i32, i32, i32, i32) {
    %c0_i32 = arith.constant 0 : i32
    %c0_i32_0 = arith.constant 0 : i32
    %c0_i32_1 = arith.constant 0 : i32
    %c0_i32_2 = arith.constant 0 : i32
    return %c0_i32, %c0_i32_0, %arg1, %c0_i32_1 : i32, i32, i32, i32
  }
  func.func @transform_2(%arg0: i32, %arg1: i32) -> (i32, i32, i32, i32) {
    %c0_i32 = arith.constant 0 : i32
    %c0_i32_0 = arith.constant 0 : i32
    %c0_i32_1 = arith.constant 0 : i32
    %c0_i32_2 = arith.constant 0 : i32
    return %c0_i32, %c0_i32_0, %arg1, %c0_i32_1 : i32, i32, i32, i32
  }
  func.func @transform_3(%arg0: i32, %arg1: i32) -> (i32, i32, i32, i32) {
    %c0_i32 = arith.constant 0 : i32
    %c0_i32_0 = arith.constant 0 : i32
    %c0_i32_1 = arith.constant 0 : i32
    return %c0_i32, %arg0, %arg1, %c0_i32_0 : i32, i32, i32, i32
  }
}

</mosaic_0001>

<bundles_post_ra>
// kernel: tpu_custom_call.1
= control target key start
LH: loop header
LB: loop body
LE: loop exit
PB: predicated region body
PF: predicated region fallthrough
CT: control target
= control target key end

     0   :  { %8 = vsyncpa [#allocation3], 0  ;;  %s806_s0 = inlined_call_operand.hbm [shape: f32[2,3,4,64], index: 0, kind: input, shape index: {}]   ;;  %s807_s1 = inlined_call_operand.vmem [shape: f32[1,1,4,1], index: 1, kind: input, shape index: {}]   ;;  %s808_s2 = inlined_call_operand.vmem [shape: f32[1,1,4,1], index: 2, kind: input, shape index: {}]   ;;  %s809_s3 = inlined_call_operand.hbm [shape: f32[2,3,4,64], index: 3, kind: output, shape index: {}]  }
   0x1   :  { %10 = vsyncpa [#allocation3 + $0x1], 0 }
   0x2   :  { %11 = vsyncpa [#allocation4], 0 }
   0x3   :  { %13 = vsyncpa [#allocation4 + $0x1], 0  ;;  %s644_s12 = smov 0   ;;  %s646_s13 = smov 0  }
   0x4   :  { %s648_s14 = smov 0   ;;  %s650_s15 = smov 0  }
   0x5   :  { %s652_s16 = smov 0   ;;  %s654_s17 = smov 0  }
   0x6 LB: > { %s417_s18 = sadd.s32 4294967295, %s613_s17   ;;  %s418_s19 = sadd.s32 4294967294, %s613_s17   ;;  %s613_s17 = sphi %s654_s17, %s19_s17   ;;  %s609_s16 = sphi %s652_s16, %s819_s16   ;;  %s605_s15 = sphi %s650_s15, %s818_s15   ;;  %s601_s14 = sphi %s648_s14, %s817_s14   ;;  %s597_s13 = sphi %s646_s13, %s816_s13   ;;  %s593_s12 = sphi %s644_s12, %s815_s12  }
   0x7   : > { %s31_s20 = sadd.s32 1, %s609_s16  ;;  %s40_s21 = sadd.s32 1, %s601_s14 }
   0x8   : > { %p33_p0 = scmp.ge.s32.totalorder %s31_s20, 3  ;;  %p47_p1 = scmp.ne.s32.totalorder %s601_s14, %s597_s13 }
   0x9   : > { %p48_p2 = scmp.eq.s32.totalorder %s613_s17, 0  ;;  %p53_p3 = scmp.ne.s32.totalorder %s597_s13, %s593_s12 }
   0xa   : > { %s821_s20 = smov (%p33_p0, %s31_s20), 0  ;;  %p54_p5 = scmp.eq.s32.totalorder %s417_s18, 0 }
   0xb   : > { %p685_p4 = por %p48_p2, %p47_p1  ;;  %s35_s23 = ssub.s32 %s609_s16, %s821_s20 }
   0xc   : > { %p131_p6 = scmp.eq.s32.totalorder %s417_s18, 2  ;;  %p38_p7 = scmp.eq.s32.totalorder %s35_s23, 0 }
   0xd   : > { %p691_p8 = por %p54_p5, %p53_p3  ;;  %p137_p10 = scmp.eq.s32.totalorder %s418_s19, 2 }
   0xe   : > { %p695_p9 = por %p131_p6, %p47_p1  ;;  %p444_p12 = scmp.lt.s32.totalorder %s613_s17, 3 }
   0xf   : > { %s700_s26 = scalar_select %p38_p7, %s601_s14, %s40_s21  }
  0x10   : > { %p702_p11 = por %p137_p10, %p53_p3  ;;  %s171_s28 = sand.u32 1, %s601_s14  }
  0x11   : > { %s423_s29 = sshll.u32 %s171_s28, 3  ;;  %s424_s30 = sshll.u32 %s609_s16, 6 }
  0x12   : > { %s181_s6 = scalar_lea.hbm %s806_s0, %s424_s30  ;;  %s175_s7 = scalar_lea.vmem [#allocation2], %s423_s29 }
  0x13   : > { %s182_s8 = sshll.u32 %s175_s7, 4  ;;  %p714_p13 = pnand %p444_p12, %p685_p4  ;;  %s183_s8 = int_to_ptr.vmem [resolvable:$true] %s182_s8 }
  0x14   : > { %s172_s10 = scalar_lea.sflag [#allocation3], %s171_s28  ;;  %s518_s11 = scalar_lea.vmem %s183_s8, 128 }
  0x15   : > { %p507_p0 = pneg %p714_p13  ;;  %p519_p1 = scmp.ne.s32.totalorder %s183_s8, %s518_s11 }
  0x16   : > { %s615_s18 = smov [#allocation2]  }
  0x17   : > { %p521_p2 = pnand %p519_p1, %p507_p0  ;;  %s523_s19 = sshll.u32 %s615_s18, 4  ;;  %s524_s19 = int_to_ptr.vmem [resolvable:$false] %s523_s19 }
  0x18   : > { %s525_s21 = scalar_lea.vmem %s524_s19, 256  ;;  %p526_p5 = scmp.lt.s32.totalorder %s183_s8, %s524_s19 }
  0x19   : > { %p522_p3 = pneg %p521_p2  ;;  %p527_p6 = scmp.lt.s32.totalorder %s525_s21, %s518_s11 }
  0x1b   : > { %p528_p7 = por %p527_p6, %p526_p5 }
  0x1d   : > { %p529_p10 = pnand %p528_p7, %p522_p3 }
  0x1f   : > { %532 = shalt.err (!%p529_p10)
}
  0x20   : > { %s616_s22 = smov 192   ;;  %s617_s23 = smov 64  }
  0x21   : > { %s618_s28 = smov 4   ;;  %p425_p4 = scmp.ge.s32.totalorder %s613_s17, 1 }
  0x22   : > { %439 = dma.hbm_to_vmem [thread:$0]  (!%p714_p13), %s181_s6, 128, %s183_s8, %s172_s10, %s616_s22, %s617_s23, %s618_s28  }
  0x23   : > { %p190_p12 = scmp.lt.s32.totalorder %s613_s17, 4 }
  0x25   : > { %p191_p0 = pnand %p425_p4, %p190_p12 }
  0x26   : > { %s725_s29 = sand.u32 (!%p191_p0), 1, %s597_s13  }
  0x27   : > { %194 = sbr.rel (%p191_p0) target bundleno = 509 (0x1fd), region = 32  ;;  %s426_s30 = sshll.u32 (!%p191_p0), %s725_s29, 3 }
  0x28   : > { %s197_s4 = scalar_lea.sflag (!%p191_p0), [#allocation3], %s725_s29  ;;  %s200_s5 = scalar_lea.vmem (!%p191_p0), [#allocation2], %s426_s30 }
  0x2c   : > { %584 = dma.done.wait (%p691_p8), %s197_s4, 128  }
  0x2d   : > { %586 = vsyncadd (%p691_p8), %s197_s4, 4294967168  ;;  %vm241_vm0 = vcmask 519168   ;;  %v239_v0 = vld [vmem:[%s200_s5] sm:$0xf]  ;;  %v240_v1 = vld [vmem:[%s200_s5 + $0x4] sm:$0xf] }
  0x2e   : > { %v242_v2 = vsel %vm241_vm0, %v239_v0, 0.0  ;;  %v245_v3 = vsel %vm241_vm0, %v240_v1, 0.0  ;;  %vm248_vm1 = vcmask 1043456   ;;  %v619_v16 = vmov 0   ;;  %v269_v24 = vld [vmem:[%s807_s1] sm:$0xf] }
  0x2f   : > { %243 = vadd.xlane.f32.xlu0 %v242_v2  ;;  %502 = vset.pattern.permute.xlu1 %v619_v16  ;;  %v271_v27 = vld [vmem:[%s808_s2] sm:$0xf]  ;;  %s230_s9 = scalar_lea.vmem [#allocation5], %s426_s30  ;;  %s429_s11 = sshll.u32 %s605_s15, 6 }
  0x30   : > { %501 = vset.pattern.permute.xlu0 %v619_v16  ;;  %s304_s10 = sshll.u32 %s230_s9, 4  ;;  %s757_s21 = scalar_lea.hbm %s809_s3, %s429_s11  ;;  %s752_s10 = int_to_ptr.vmem [resolvable:$true] %s304_s10 }
  0x31   : > { %s291_s15 = scalar_lea.sflag [#allocation4], %s725_s29  ;;  %s533_s22 = scalar_lea.vmem %s752_s10, 128 }
  0x32   : > { %p534_p8 = scmp.ne.s32.totalorder %s752_s10, %s533_s22  ;;  %s620_s23 = smov [#allocation5]  }
  0x33   : > { %246 = vadd.xlane.f32.xlu0 %v245_v3  ;;  %s537_s28 = sshll.u32 %s620_s23, 4  ;;  %s538_s28 = int_to_ptr.vmem [resolvable:$false] %s537_s28 }
  0x34   : > { %p535_p13 = pnand %p534_p8, %p695_p9  ;;  %s539_s30 = scalar_lea.vmem %s538_s28, 256 }
  0x35   : > { %p540_p2 = scmp.lt.s32.totalorder %s752_s10, %s538_s28  ;;  %p541_p3 = scmp.lt.s32.totalorder %s539_s30, %s533_s22 }
  0x36   : > { %p536_p1 = pneg %p535_p13 }
  0x37   : > { %p542_p5 = por %p541_p3, %p540_p2 }
  0x39   : > { %p543_p6 = pnand %p542_p5, %p536_p1 }
  0xb8   : > { %v244_v4 = vpop.xlane.xlu0 %243 }
  0xb9   : > { %v249_v6 = vsel %vm248_vm1, %v244_v4, 0.0 }
  0xbc   : > { %v247_v5 = vpop.xlane.xlu0 %246 }
  0xbd   : > { %v250_v7 = vsel %vm248_vm1, %v247_v5, 0.0 }
  0xbe   : > { %v251_v8 = vadd.f32 %v250_v7, %v249_v6 }
  0xc0   : > { %v252_v9 = vmul.f32 0.0078125, %v251_v8 }
  0xc2   : > { %v253_v10 = vsub.f32 %v239_v0, %v252_v9  ;;  %v254_v11 = vsub.f32 %v240_v1, %v252_v9 }
  0xc4   : > { %v255_v12 = vmul.f32 %v253_v10, %v253_v10  ;;  %v256_v14 = vmul.f32 %v254_v11, %v254_v11 }
  0xc6   : > { %v257_v13 = vsel %vm241_vm0, %v255_v12, 0.0  ;;  %v260_v15 = vsel %vm241_vm0, %v256_v14, 0.0 }
  0xc7   : > { %258 = vadd.xlane.f32.xlu1 %v257_v13 }
  0xcb   : > { %261 = vadd.xlane.f32.xlu1 %v260_v15 }
 0x150   : > { %v259_v17 = vpop.xlane.xlu1 %258 }
 0x151   : > { %v263_v19 = vsel %vm248_vm1, %v259_v17, 0.0 }
 0x154   : > { %v262_v18 = vpop.xlane.xlu1 %261 }
 0x155   : > { %v264_v20 = vsel %vm248_vm1, %v262_v18, 0.0 }
 0x156   : > { %v265_v21 = vadd.f32 %v264_v20, %v263_v19 }
 0x158   : > { %v266_v22 = vmul.f32 0.0078125, %v265_v21 }
 0x15a   : > { %v267_v23 = vadd.f32 1e-05, %v266_v22 }
 0x15c   : > { %503 = vrsqrt.f32 %v267_v23 }
 0x169   : > { %v504_v25 = vpop.eup %503 }
 0x16a   : > { %v270_v26 = vmul.f32 %v504_v25, %v269_v24 }
 0x16c   : > { %276 = vperm.xlu0 %501, %v270_v26   ;;  %v272_v28 = vmul.f32 %v270_v26, %v252_v9 }
 0x16e   : > { %v273_v29 = vsub.f32 %v271_v27, %v272_v28 }
 0x170   : > { %283 = vperm.xlu1 %502, %v273_v29  }
 0x1e7   : > { %v277_v30 = vpop.permute.xlu0 %276 }
 0x1e8   : > { %v279_v31 = vmul.f32 %v277_v30, %v239_v0  ;;  %v280_v32 = vmul.f32 %v277_v30, %v240_v1 }
 0x1eb   : > { %v284_v33 = vpop.permute.xlu1 %283 }
 0x1ec   : > { %v286_v34 = vadd.f32 %v284_v33, %v279_v31  ;;  %v287_v35 = vadd.f32 %v284_v33, %v280_v32 }
 0x1ee   : > { %288 = vst.msk [vmem:[%s230_s9] sm:$0xf] %vm241_vm0, %v286_v34  ;;  %289 = vst.msk [vmem:[%s230_s9 + $0x4] sm:$0xf] %vm241_vm0, %v287_v35 }
 0x1ef   : > { %546 = shalt.err (!%p543_p6)
}
 0x1f0   : > { %s547_s4 = scalar_lea.hbm %s757_s21, 128  ;;  %s551_s6 = scalar_lea.hbm %s809_s3, 384 }
 0x1f1   : > { %p548_p7 = scmp.ne.s32.totalorder %s757_s21, %s547_s4  ;;  %p552_p12 = scmp.lt.s32.totalorder %s757_s21, %s809_s3 }
 0x1f2   : > { %p553_p0 = scmp.lt.s32.totalorder %s551_s6, %s547_s4 }
 0x1f3   : > { %p549_p10 = pnand %p548_p7, %p695_p9 }
 0x1f4   : > { %p554_p8 = por %p553_p0, %p552_p12 }
 0x1f5   : > { %p550_p4 = pneg %p549_p10 }
 0x1f7   : > { %p555_p13 = pnand %p554_p8, %p550_p4 }
 0x1f9   : > { %558 = shalt.err (!%p555_p13)
}
 0x1fa   : > { %s621_s9 = smov 64   ;;  %s622_s11 = smov 192  }
 0x1fb   : > { %s623_s18 = smov 4  }
 0x1fc   : > { %434 = dma.vmem_to_hbm [thread:$0]  (%p695_p9), %s752_s10, 128, %s757_s21, %s291_s15, %s621_s9, %s622_s11, %s623_s18  }
 0x1fd PF: > { %p445_p1 = scmp.ge.s32.totalorder %s613_s17, 2  ;;  %s319_s19 = sand.u32 1, %s593_s12  }
 0x1fe   : > { %s320_s22 = scalar_lea.sflag [#allocation4], %s319_s19 }
 0x1ff   : > { %p441_p2 = pnand %p445_p1, %p702_p11 }
 0x201   : > { %p442_p3 = pneg %p441_p2 }
 0x203   : > { %588 = dma.done.wait (%p442_p3), %s320_s22, 128  }
 0x204   : > { %590 = vsyncadd (%p442_p3), %s320_s22, 4294967168  ;;  %s19_s17 = sadd.s32 1, %s613_s17   ;;  %s815_s12 = smov %s597_s13 }
 0x205   : > { %p16_p5 = scmp.ge.s32.totalorder %s19_s17, 5   ;;  %s816_s13 = smov %s601_s14 }
 0x206   : > { %s817_s14 = smov %s700_s26  ;;  %s818_s15 = smov %s609_s16 }
 0x207   : > { %s819_s16 = smov %s821_s20  ;;  %18 = sbr.rel (!%p16_p5) target bundleno = 6 (0x6), region = 83 }
 0x20c   :  { %325 = vsyncpa [#allocation3], 1 }
 0x20d   :  { %327 = vsyncpa [#allocation3 + $0x1], 1 }
 0x20e   :  { %328 = vsyncpa [#allocation4], 1 }
 0x20f   :  { %330 = vsyncpa [#allocation4 + $0x1], 1 }

</bundles_post_ra>
